<compile_context>
chip_gen: v7x
topology: tpu7x:2x2x1
jax: 0.10.0
libtpu: 0.0.40
codegen_flags: <defaults>
</compile_context>

<pallas_src>
import jax
import jax.numpy as jnp
from jax.experimental import pallas as pl
from jax.experimental.pallas import tpu as pltpu

BN_EPS = 1e-5


def _round_up(x, m):
    return (x + m - 1) // m * m


def _choose_tile(batch, max_tile):
    """One tile when B <= max_tile, else ~B/ceil(B/max_tile), rounded to 8."""
    if batch <= max_tile:
        return _round_up(batch, 8)
    n_tiles = -(-batch // max_tile)
    return _round_up(-(-batch // n_tiles), 8)


def _vmem_limit(est_bytes):
    # v5e's scoped-VMEM default is only 16 MiB; ask for what we need with
    # headroom, capped below v7x's 64 MiB physical VMEM.
    return int(min(max(2 * est_bytes, 32 << 20), 56 << 20))


def critic_forward(state, action, params, *, max_tile=2048,
                   force_two_pass=False, fused_h1_limit_bytes=24 << 20):
    """Forward pass of the Critic (training-mode BatchNorm). Returns (B, 1)."""
    B, ds = state.shape
    Ba, da = action.shape
    assert Ba == B
    f1 = params["gamma"].shape[1]
    f2 = params["b2"].shape[1]

    tb = _choose_tile(B, max_tile)
    num_tiles = -(-B // tb)
    b_pad = num_tiles * tb
    if b_pad != B:
        # Zero rows are exactly neutral for the BatchNorm statistics because
        # the fc1 bias is dropped (training-mode BN cancels it anyway): padded
        # rows contribute 0 to both the sum and the sum of squares.
        state = jnp.pad(state, ((0, b_pad - B), (0, 0)))
        action = jnp.pad(action, ((0, b_pad - B), (0, 0)))
    inv_b = 1.0 / float(B)          # statistics over the *real* batch only

    w1_s, w1_a = params["w1_s"], params["w1_a"]
    gamma, beta = params["gamma"], params["beta"]
    w2, b2 = params["w2"], params["b2"]
    w3_row, b3 = params["w3_row"], params["b3"]

    def const2(shape):              # constant block, 2-D grid (phase, tile)
        return pl.BlockSpec(shape, lambda p, t: (0, 0))

    def const1(shape):              # constant block, 1-D grid (tile)
        return pl.BlockSpec(shape, lambda t: (0, 0))

    smem_spec = pl.BlockSpec(memory_space=pltpu.MemorySpace.SMEM)

    fused = (not force_two_pass) and (b_pad * f1 * 4 <= fused_h1_limit_bytes)

    if fused:
        # ------------------ single fused call: phase 0 = stats, 1 = fwd ------
        def fused_kernel(s_ref, a_ref, w1s_ref, w1a_ref, g_ref, bt_ref,
                         w2_ref, b2_ref, w3_ref, b3_ref,
                         o_ref, h1_buf, sum_ref, sq_ref):
            phase = pl.program_id(0)
            t = pl.program_id(1)

            @pl.when(phase == 0)
            def _stats_phase():
                @pl.when(t == 0)
                def _():
                    sum_ref[...] = jnp.zeros_like(sum_ref)
                    sq_ref[...] = jnp.zeros_like(sq_ref)

                # fc1 (bias dropped: training-mode BN cancels it exactly).
                h1 = (jnp.dot(s_ref[...].astype(jnp.bfloat16), w1s_ref[...],
                              preferred_element_type=jnp.float32)
                      + jnp.dot(a_ref[...].astype(jnp.bfloat16), w1a_ref[...],
                                preferred_element_type=jnp.float32))
                h1_buf[t] = h1
                sum_ref[...] += jnp.sum(h1, axis=0, keepdims=True)
                sq_ref[...] += jnp.sum(h1 * h1, axis=0, keepdims=True)

                # Last tile: fold BN into one scale/shift (reuse the scratch).
                @pl.when(t == pl.num_programs(1) - 1)
                def _():
                    mean = sum_ref[...] * inv_b
                    # TODO(synk): for very large B, use shifted/centered sums;
                    # E[x^2]-E[x]^2 in f32 can cancel when |mean| >> std.
                    var = jnp.maximum(sq_ref[...] * inv_b - mean * mean, 0.0)
                    scale = g_ref[...] * jax.lax.rsqrt(var + BN_EPS)
                    sum_ref[...] = scale
                    sq_ref[...] = bt_ref[...] - mean * scale

            @pl.when(phase == 1)
            def _fwd_phase():
                h1 = jnp.maximum(h1_buf[t] * sum_ref[...] + sq_ref[...], 0.0)
                h2 = jnp.maximum(
                    jnp.dot(h1.astype(jnp.bfloat16), w2_ref[...],
                            preferred_element_type=jnp.float32) + b2_ref[...],
                    0.0)
                # fc3 (N=1): VPU multiply + lane reduce instead of MXU matmul.
                q = jnp.sum(h2 * w3_ref[...], axis=1, keepdims=True) + b3_ref[0, 0]
                o_ref[...] = q.astype(o_ref.dtype)

        est = (b_pad * f1 * 4                       # resident h1 stash
               + 4 * tb * (ds + da) * 4             # state/action double buffers
               + 4 * tb * 4                         # output double buffer
               + 4 * ((ds + da) * f1 + f1 * f2)     # bf16 weights (x2 buffers)
               + 16 * f1 * 4 + (1 << 20))

        q_pad = pl.pallas_call(
            fused_kernel,
            out_shape=jax.ShapeDtypeStruct((b_pad, 1), jnp.float32),
            grid=(2, num_tiles),
            in_specs=[
                # phase 1 does not need state/action: pin the block index at 0
                # so no re-DMA happens after phase 0.
                pl.BlockSpec((tb, ds), lambda p, t: (t * (1 - p), 0)),
                pl.BlockSpec((tb, da), lambda p, t: (t * (1 - p), 0)),
                const2((ds, f1)), const2((da, f1)),
                const2((1, f1)), const2((1, f1)),
                const2((f1, f2)), const2((1, f2)), const2((1, f2)),
                smem_spec,
            ],
            # output only advances during phase 1; stays resident in phase 0.
            out_specs=pl.BlockSpec((tb, 1), lambda p, t: (t * p, 0)),
            scratch_shapes=[
                pltpu.VMEM((num_tiles, tb, f1), jnp.float32),   # h1 stash
                pltpu.VMEM((1, f1), jnp.float32),               # sum -> scale
                pltpu.VMEM((1, f1), jnp.float32),               # sumsq -> shift
            ],
            compiler_params=pltpu.CompilerParams(
                dimension_semantics=("arbitrary", "arbitrary"),
                vmem_limit_bytes=_vmem_limit(est)),
        )(state, action, w1_s, w1_a, gamma, beta, w2, b2, w3_row, b3)

    else:
        # ------------------ two-pass fallback (h1 too big for VMEM) ----------
        # TODO(synk): on v7x the stats pass could be sharded across the two
        # TensorCores with per-core partial sums; kept single-core here.
        est = (4 * tb * (ds + da) * 4
               + 2 * tb * (f1 + f2) * 4
               + 4 * ((ds + da) * f1 + f1 * f2)
               + 16 * f1 * 4 + (1 << 20))
        vmem_bytes = _vmem_limit(est)

        def stats_kernel(s_ref, a_ref, w1s_ref, w1a_ref, g_ref, bt_ref,
                         scale_ref, shift_ref):
            t = pl.program_id(0)

            @pl.when(t == 0)
            def _():
                scale_ref[...] = jnp.zeros_like(scale_ref)
                shift_ref[...] = jnp.zeros_like(shift_ref)

            h1 = (jnp.dot(s_ref[...].astype(jnp.bfloat16), w1s_ref[...],
                          preferred_element_type=jnp.float32)
                  + jnp.dot(a_ref[...].astype(jnp.bfloat16), w1a_ref[...],
                            preferred_element_type=jnp.float32))
            scale_ref[...] += jnp.sum(h1, axis=0, keepdims=True)      # run. sum
            shift_ref[...] += jnp.sum(h1 * h1, axis=0, keepdims=True)  # run. sumsq

            @pl.when(t == pl.num_programs(0) - 1)
            def _():
                mean = scale_ref[...] * inv_b
                var = jnp.maximum(shift_ref[...] * inv_b - mean * mean, 0.0)
                sc = g_ref[...] * jax.lax.rsqrt(var + BN_EPS)
                scale_ref[...] = sc
                shift_ref[...] = bt_ref[...] - mean * sc

        scale, shift = pl.pallas_call(
            stats_kernel,
            out_shape=(jax.ShapeDtypeStruct((1, f1), jnp.float32),
                       jax.ShapeDtypeStruct((1, f1), jnp.float32)),
            grid=(num_tiles,),
            in_specs=[
                pl.BlockSpec((tb, ds), lambda t: (t, 0)),
                pl.BlockSpec((tb, da), lambda t: (t, 0)),
                const1((ds, f1)), const1((da, f1)),
                const1((1, f1)), const1((1, f1)),
            ],
            out_specs=(const1((1, f1)), const1((1, f1))),
            compiler_params=pltpu.CompilerParams(
                dimension_semantics=("arbitrary",),
                vmem_limit_bytes=vmem_bytes),
        )(state, action, w1_s, w1_a, gamma, beta)

        def fwd_kernel(s_ref, a_ref, sc_ref, sh_ref, w1s_ref, w1a_ref,
                       w2_ref, b2_ref, w3_ref, b3_ref, o_ref):
            h1 = (jnp.dot(s_ref[...].astype(jnp.bfloat16), w1s_ref[...],
                          preferred_element_type=jnp.float32)
                  + jnp.dot(a_ref[...].astype(jnp.bfloat16), w1a_ref[...],
                            preferred_element_type=jnp.float32))
            h1 = jnp.maximum(h1 * sc_ref[...] + sh_ref[...], 0.0)
            h2 = jnp.maximum(
                jnp.dot(h1.astype(jnp.bfloat16), w2_ref[...],
                        preferred_element_type=jnp.float32) + b2_ref[...], 0.0)
            q = jnp.sum(h2 * w3_ref[...], axis=1, keepdims=True) + b3_ref[0, 0]
            o_ref[...] = q.astype(o_ref.dtype)

        q_pad = pl.pallas_call(
            fwd_kernel,
            out_shape=jax.ShapeDtypeStruct((b_pad, 1), jnp.float32),
            grid=(num_tiles,),
            in_specs=[
                pl.BlockSpec((tb, ds), lambda t: (t, 0)),
                pl.BlockSpec((tb, da), lambda t: (t, 0)),
                const1((1, f1)), const1((1, f1)),
                const1((ds, f1)), const1((da, f1)),
                const1((f1, f2)), const1((1, f2)), const1((1, f2)),
                smem_spec,
            ],
            out_specs=pl.BlockSpec((tb, 1), lambda t: (t, 0)),
            compiler_params=pltpu.CompilerParams(
                dimension_semantics=("parallel",),
                vmem_limit_bytes=vmem_bytes),
        )(state, action, scale, shift, w1_s, w1_a, w2, b2, w3_row, b3)

    return q_pad[:B]


def init_critic_params(key, state_dim, action_dim, fc1_dim, fc2_dim):
    """Deterministic init mirroring the PyTorch module's scheme.

    hidden_init() in the reference uses weight.size()[0], which for nn.Linear
    is out_features — we reproduce that quirk.  Matmul weights are stored bf16
    (MXU inputs); biases / BN params stay f32.
    """
    ks = jax.random.split(key, 8)
    state_size = state_dim + action_dim

    def uni(k, shape, lim, dtype=jnp.float32):
        return jax.random.uniform(k, shape, jnp.float32,
                                  minval=-lim, maxval=lim).astype(dtype)

    lim1 = 1.0 / (fc1_dim ** 0.5)     # hidden_init quirk (= out_features)
    lim2 = 1.0 / (fc2_dim ** 0.5)
    return {
        "w1_s": uni(ks[0], (state_dim, fc1_dim), lim1, jnp.bfloat16),
        "w1_a": uni(ks[1], (action_dim, fc1_dim), lim1, jnp.bfloat16),
        # fc1 bias is kept only for the f32 reference: training-mode BatchNorm
        # cancels it exactly, so the kernel never reads it.
        "b1": uni(ks[2], (1, fc1_dim), 1.0 / (state_size ** 0.5)),
        "gamma": jnp.ones((1, fc1_dim), jnp.float32),
        "beta": jnp.zeros((1, fc1_dim), jnp.float32),
        "w2": uni(ks[3], (fc1_dim, fc2_dim), lim2, jnp.bfloat16),
        "b2": uni(ks[4], (1, fc2_dim), 1.0 / (fc1_dim ** 0.5)),
        "w3_row": uni(ks[5], (1, fc2_dim), 3e-3),          # f32; used on VPU
        "b3": uni(ks[6], (1, 1), 1.0 / (fc2_dim ** 0.5)),
    }


def critic_reference_matched(state, action, params):
    """Pure-JAX reference using the same bf16-input / f32-accumulate math."""
    B = state.shape[0]
    h1 = (jnp.dot(state.astype(jnp.bfloat16), params["w1_s"],
                  preferred_element_type=jnp.float32)
          + jnp.dot(action.astype(jnp.bfloat16), params["w1_a"],
                    preferred_element_type=jnp.float32))
    mean = jnp.sum(h1, axis=0, keepdims=True) / B
    var = jnp.maximum(jnp.sum(h1 * h1, axis=0, keepdims=True) / B - mean * mean, 0.0)
    scale = params["gamma"] * jax.lax.rsqrt(var + BN_EPS)
    shift = params["beta"] - mean * scale
    h1 = jnp.maximum(h1 * scale + shift, 0.0)
    h2 = jnp.maximum(
        jnp.dot(h1.astype(jnp.bfloat16), params["w2"],
                preferred_element_type=jnp.float32) + params["b2"], 0.0)
    return jnp.sum(h2 * params["w3_row"], axis=1, keepdims=True) + params["b3"]


def critic_reference_f32(state, action, params):
    """Full-f32 reference matching the PyTorch module's math (with fc1 bias)."""
    x = jnp.concatenate([state, action], axis=1)
    w1 = jnp.concatenate([params["w1_s"], params["w1_a"]], axis=0).astype(jnp.float32)
    h1 = x @ w1 + params["b1"]
    mean = jnp.mean(h1, axis=0, keepdims=True)
    var = jnp.mean((h1 - mean) ** 2, axis=0, keepdims=True)
    h1 = (h1 - mean) * jax.lax.rsqrt(var + BN_EPS)
    h1 = jnp.maximum(h1 * params["gamma"] + params["beta"], 0.0)
    h2 = jnp.maximum(h1 @ params["w2"].astype(jnp.float32) + params["b2"], 0.0)
    return h2 @ params["w3_row"].T + params["b3"]


if __name__ == "__main__":
    # Small shapes: batch=30 (exercises zero-row padding), state_size=24+8=32.
    B, STATE_DIM, ACTION_DIM = 30, 24, 8
    FC1, FC2 = 64, 32

    key = jax.random.PRNGKey(0)
    k_s, k_a, k_p = jax.random.split(key, 3)
    state = jax.random.normal(k_s, (B, STATE_DIM), jnp.float32)
    action = jax.random.normal(k_a, (B, ACTION_DIM), jnp.float32)
    params = init_critic_params(k_p, STATE_DIM, ACTION_DIM, FC1, FC2)

    q_ref_m = critic_reference_matched(state, action, params)
    q_ref32 = critic_reference_f32(state, action, params)

    # 1) fused single-call path, single batch tile (default)
    q_fused = jax.block_until_ready(critic_forward(state, action, params))
    # 2) fused path, several batch tiles (cross-tile BatchNorm statistics)
    q_multi = jax.block_until_ready(
        critic_forward(state, action, params, max_tile=8))
    # 3) two-pass fallback (used when the h1 stash would not fit in VMEM)
    q_twop = jax.block_until_ready(
        critic_forward(state, action, params, max_tile=8, force_two_pass=True))

    for name, q in (("fused", q_fused), ("fused_multi_tile", q_multi),
                    ("two_pass", q_twop)):
        assert q.shape == (B, 1), (name, q.shape)
        assert jnp.allclose(q, q_ref_m, atol=1e-4, rtol=1e-4), \
            f"{name}: mismatch vs matched reference"
        # bf16 MXU inputs vs pure-f32 math: small, BN-absorbed deviation.
        assert jnp.allclose(q, q_ref32, atol=3e-2, rtol=3e-2), \
            f"{name}: mismatch vs f32 reference"

    print("KERNEL_OK")
</pallas_src>

<mosaic_0001>
module attributes {stable_mosaic.version = 11 : i64} {
  func.func @fused_kernel(%arg0: i32, %arg1: i32, %arg2: memref<32x24xf32, #tpu.memory_space<vmem>>, %arg3: memref<32x8xf32, #tpu.memory_space<vmem>>, %arg4: memref<24x64xbf16, #tpu.memory_space<vmem>>, %arg5: memref<8x64xbf16, #tpu.memory_space<vmem>>, %arg6: memref<1x64xf32, #tpu.memory_space<vmem>>, %arg7: memref<1x64xf32, #tpu.memory_space<vmem>>, %arg8: memref<64x32xbf16, #tpu.memory_space<vmem>>, %arg9: memref<1x32xf32, #tpu.memory_space<vmem>>, %arg10: memref<1x32xf32, #tpu.memory_space<vmem>>, %arg11: memref<1x1xf32, #tpu.memory_space<smem>>, %arg12: memref<32x1xf32, #tpu.memory_space<vmem>>, %arg13: memref<1x32x64xf32, #tpu.memory_space<vmem>>, %arg14: memref<1x64xf32, #tpu.memory_space<vmem>>, %arg15: memref<1x64xf32, #tpu.memory_space<vmem>>) attributes {dimension_semantics = [#tpu.dimension_semantics<arbitrary>, #tpu.dimension_semantics<arbitrary>], iteration_bounds = array<i64: 2, 1>, scalar_prefetch = 0 : i64, scratch_operands = 3 : i64, tpu.core_type = #tpu.core_type<tc>, window_params = [{transform_indices = @transform_0, window_bounds = array<i64: 32, 24>}, {transform_indices = @transform_1, window_bounds = array<i64: 32, 8>}, {pipeline_mode = #tpu.pipeline_mode<synchronous>, transform_indices = @transform_2, window_bounds = array<i64: 24, 64>}, {pipeline_mode = #tpu.pipeline_mode<synchronous>, transform_indices = @transform_3, window_bounds = array<i64: 8, 64>}, {pipeline_mode = #tpu.pipeline_mode<synchronous>, transform_indices = @transform_4, window_bounds = array<i64: 1, 64>}, {pipeline_mode = #tpu.pipeline_mode<synchronous>, transform_indices = @transform_5, window_bounds = array<i64: 1, 64>}, {pipeline_mode = #tpu.pipeline_mode<synchronous>, transform_indices = @transform_6, window_bounds = array<i64: 64, 32>}, {pipeline_mode = #tpu.pipeline_mode<synchronous>, transform_indices = @transform_7, window_bounds = array<i64: 1, 32>}, {pipeline_mode = #tpu.pipeline_mode<synchronous>, transform_indices = @transform_8, window_bounds = array<i64: 1, 32>}, {transform_indices = @transform_9, window_bounds = array<i64: 1, 1>}, {transform_indices = @transform_10, window_bounds = array<i64: 32, 1>}]} {
    %c0_i32 = arith.constant 0 : i32
    %0 = arith.cmpi eq, %arg0, %c0_i32 : i32
    %1 = arith.extui %0 : i1 to i32
    %c0_i32_0 = arith.constant 0 : i32
    %2 = arith.cmpi ne, %1, %c0_i32_0 : i32
    scf.if %2 {
      %c0_i32_2 = arith.constant 0 : i32
      %6 = arith.cmpi eq, %arg1, %c0_i32_2 : i32
      %7 = arith.extui %6 : i1 to i32
      %c0_i32_3 = arith.constant 0 : i32
      %8 = arith.cmpi ne, %7, %c0_i32_3 : i32
      scf.if %8 {
        %cst_26 = arith.constant 0.000000e+00 : f32
        %36 = vector.broadcast %cst_26 : f32 to vector<1x64xf32>
        %c0_27 = arith.constant 0 : index
        %c0_28 = arith.constant 0 : index
        %37 = vector.load %arg14[%c0_27, %c0_28] : memref<1x64xf32, #tpu.memory_space<vmem>>, vector<1x64xf32>
        tpu.vector_store %arg14[%c0_27, %c0_28], %36 {strides = array<i32>} : memref<1x64xf32, #tpu.memory_space<vmem>>, vector<1x64xf32>,
        %cst_29 = arith.constant 0.000000e+00 : f32
        %38 = vector.broadcast %cst_29 : f32 to vector<1x64xf32>
        %c0_30 = arith.constant 0 : index
        %c0_31 = arith.constant 0 : index
        %39 = vector.load %arg15[%c0_30, %c0_31] : memref<1x64xf32, #tpu.memory_space<vmem>>, vector<1x64xf32>
        tpu.vector_store %arg15[%c0_30, %c0_31], %38 {strides = array<i32>} : memref<1x64xf32, #tpu.memory_space<vmem>>, vector<1x64xf32>,
      } else {
      }
      %c0 = arith.constant 0 : index
      %c0_4 = arith.constant 0 : index
      %9 = vector.load %arg2[%c0, %c0_4] : memref<32x24xf32, #tpu.memory_space<vmem>>, vector<32x24xf32>
      %10 = arith.truncf %9 : vector<32x24xf32> to vector<32x24xbf16>
      %c0_5 = arith.constant 0 : index
      %c0_6 = arith.constant 0 : index
      %11 = vector.load %arg4[%c0_5, %c0_6] : memref<24x64xbf16, #tpu.memory_space<vmem>>, vector<24x64xbf16>
      %cst = arith.constant dense<0.000000e+00> : vector<32x64xf32>
      %12 = tpu.matmul %10, %11, %cst {dimension_numbers = #tpu.dot_dimension_numbers<[1], [0], [0], [1], [0, 0, 1, 1], [], []>} : vector<32x24xbf16>, vector<24x64xbf16>, vector<32x64xf32> -> vector<32x64xf32>
      %c0_7 = arith.constant 0 : index
      %c0_8 = arith.constant 0 : index
      %13 = vector.load %arg3[%c0_7, %c0_8] : memref<32x8xf32, #tpu.memory_space<vmem>>, vector<32x8xf32>
      %14 = arith.truncf %13 : vector<32x8xf32> to vector<32x8xbf16>
      %c0_9 = arith.constant 0 : index
      %c0_10 = arith.constant 0 : index
      %15 = vector.load %arg5[%c0_9, %c0_10] : memref<8x64xbf16, #tpu.memory_space<vmem>>, vector<8x64xbf16>
      %cst_11 = arith.constant dense<0.000000e+00> : vector<32x64xf32>
      %16 = tpu.matmul %14, %15, %cst_11 {dimension_numbers = #tpu.dot_dimension_numbers<[1], [0], [0], [1], [0, 0, 1, 1], [], []>} : vector<32x8xbf16>, vector<8x64xbf16>, vector<32x64xf32> -> vector<32x64xf32>
      %17 = arith.addf %12, %16 : vector<32x64xf32>
      %18 = arith.index_cast %arg1 : i32 to index
      %c0_12 = arith.constant 0 : index
      %c0_13 = arith.constant 0 : index
      %19 = vector.load %arg13[%18, %c0_12, %c0_13] : memref<1x32x64xf32, #tpu.memory_space<vmem>>, vector<1x32x64xf32>
      %20 = vector.shape_cast %19 : vector<1x32x64xf32> to vector<32x64xf32>
      %21 = vector.shape_cast %17 : vector<32x64xf32> to vector<1x32x64xf32>
      tpu.vector_store %arg13[%18, %c0_12, %c0_13], %21 {strides = array<i32>} : memref<1x32x64xf32, #tpu.memory_space<vmem>>, vector<1x32x64xf32>,
      %c0_14 = arith.constant 0 : index
      %c0_15 = arith.constant 0 : index
      %22 = vector.load %arg14[%c0_14, %c0_15] : memref<1x64xf32, #tpu.memory_space<vmem>>, vector<1x64xf32>
      %cst_16 = arith.constant dense<0.000000e+00> : vector<64xf32>
      %23 = vector.multi_reduction <add>, %17, %cst_16 [0] : vector<32x64xf32> to vector<64xf32>
      %24 = vector.shape_cast %23 : vector<64xf32> to vector<1x64xf32>
      %25 = arith.addf %22, %24 : vector<1x64xf32>
      %c0_17 = arith.constant 0 : index
      %c0_18 = arith.constant 0 : index
      %26 = vector.load %arg14[%c0_17, %c0_18] : memref<1x64xf32, #tpu.memory_space<vmem>>, vector<1x64xf32>
      tpu.vector_store %arg14[%c0_17, %c0_18], %25 {strides = array<i32>} : memref<1x64xf32, #tpu.memory_space<vmem>>, vector<1x64xf32>,
      %c0_19 = arith.constant 0 : index
      %c0_20 = arith.constant 0 : index
      %27 = vector.load %arg15[%c0_19, %c0_20] : memref<1x64xf32, #tpu.memory_space<vmem>>, vector<1x64xf32>
      %28 = arith.mulf %17, %17 : vector<32x64xf32>
      %cst_21 = arith.constant dense<0.000000e+00> : vector<64xf32>
      %29 = vector.multi_reduction <add>, %28, %cst_21 [0] : vector<32x64xf32> to vector<64xf32>
      %30 = vector.shape_cast %29 : vector<64xf32> to vector<1x64xf32>
      %31 = arith.addf %27, %30 : vector<1x64xf32>
      %c0_22 = arith.constant 0 : index
      %c0_23 = arith.constant 0 : index
      %32 = vector.load %arg15[%c0_22, %c0_23] : memref<1x64xf32, #tpu.memory_space<vmem>>, vector<1x64xf32>
      tpu.vector_store %arg15[%c0_22, %c0_23], %31 {strides = array<i32>} : memref<1x64xf32, #tpu.memory_space<vmem>>, vector<1x64xf32>,
      %c0_i32_24 = arith.constant 0 : i32
      %33 = arith.cmpi eq, %arg1, %c0_i32_24 : i32
      %34 = arith.extui %33 : i1 to i32
      %c0_i32_25 = arith.constant 0 : i32
      %35 = arith.cmpi ne, %34, %c0_i32_25 : i32
      scf.if %35 {
        %c0_26 = arith.constant 0 : index
        %c0_27 = arith.constant 0 : index
        %36 = vector.load %arg14[%c0_26, %c0_27] : memref<1x64xf32, #tpu.memory_space<vmem>>, vector<1x64xf32>
        %cst_28 = arith.constant 0.0333333351 : f32
        %37 = vector.broadcast %cst_28 : f32 to vector<1x64xf32>
        %38 = arith.mulf %36, %37 : vector<1x64xf32>
        %c0_29 = arith.constant 0 : index
        %c0_30 = arith.constant 0 : index
        %39 = vector.load %arg15[%c0_29, %c0_30] : memref<1x64xf32, #tpu.memory_space<vmem>>, vector<1x64xf32>
        %cst_31 = arith.constant 0.0333333351 : f32
        %40 = vector.broadcast %cst_31 : f32 to vector<1x64xf32>
        %41 = arith.mulf %39, %40 : vector<1x64xf32>
        %42 = arith.mulf %38, %38 : vector<1x64xf32>
        %43 = arith.subf %41, %42 : vector<1x64xf32>
        %cst_32 = arith.constant 0.000000e+00 : f32
        %44 = vector.broadcast %cst_32 : f32 to vector<1x64xf32>
        %45 = arith.maximumf %43, %44 : vector<1x64xf32>
        %c0_33 = arith.constant 0 : index
        %c0_34 = arith.constant 0 : index
        %46 = vector.load %arg6[%c0_33, %c0_34] : memref<1x64xf32, #tpu.memory_space<vmem>>, vector<1x64xf32>
        %cst_35 = arith.constant 9.99999974E-6 : f32
        %47 = vector.broadcast %cst_35 : f32 to vector<1x64xf32>
        %48 = arith.addf %45, %47 : vector<1x64xf32>
        %49 = math.rsqrt %48 : vector<1x64xf32>
        %50 = arith.mulf %46, %49 : vector<1x64xf32>
        %c0_36 = arith.constant 0 : index
        %c0_37 = arith.constant 0 : index
        %51 = vector.load %arg14[%c0_36, %c0_37] : memref<1x64xf32, #tpu.memory_space<vmem>>, vector<1x64xf32>
        tpu.vector_store %arg14[%c0_36, %c0_37], %50 {strides = array<i32>} : memref<1x64xf32, #tpu.memory_space<vmem>>, vector<1x64xf32>,
        %c0_38 = arith.constant 0 : index
        %c0_39 = arith.constant 0 : index
        %52 = vector.load %arg7[%c0_38, %c0_39] : memref<1x64xf32, #tpu.memory_space<vmem>>, vector<1x64xf32>
        %53 = arith.mulf %38, %50 : vector<1x64xf32>
        %54 = arith.subf %52, %53 : vector<1x64xf32>
        %c0_40 = arith.constant 0 : index
        %c0_41 = arith.constant 0 : index
        %55 = vector.load %arg15[%c0_40, %c0_41] : memref<1x64xf32, #tpu.memory_space<vmem>>, vector<1x64xf32>
        tpu.vector_store %arg15[%c0_40, %c0_41], %54 {strides = array<i32>} : memref<1x64xf32, #tpu.memory_space<vmem>>, vector<1x64xf32>,
      } else {
      }
    } else {
    }
    %c1_i32 = arith.constant 1 : i32
    %3 = arith.cmpi eq, %arg0, %c1_i32 : i32
    %4 = arith.extui %3 : i1 to i32
    %c0_i32_1 = arith.constant 0 : i32
    %5 = arith.cmpi ne, %4, %c0_i32_1 : i32
    scf.if %5 {
      %6 = arith.index_cast %arg1 : i32 to index
      %c0 = arith.constant 0 : index
      %c0_2 = arith.constant 0 : index
      %7 = vector.load %arg13[%6, %c0, %c0_2] : memref<1x32x64xf32, #tpu.memory_space<vmem>>, vector<1x32x64xf32>
      %8 = vector.shape_cast %7 : vector<1x32x64xf32> to vector<32x64xf32>
      %c0_3 = arith.constant 0 : index
      %c0_4 = arith.constant 0 : index
      %9 = vector.load %arg14[%c0_3, %c0_4] : memref<1x64xf32, #tpu.memory_space<vmem>>, vector<1x64xf32>
      %10 = vector.broadcast %9 : vector<1x64xf32> to vector<32x64xf32>
      %11 = arith.mulf %8, %10 : vector<32x64xf32>
      %c0_5 = arith.constant 0 : index
      %c0_6 = arith.constant 0 : index
      %12 = vector.load %arg15[%c0_5, %c0_6] : memref<1x64xf32, #tpu.memory_space<vmem>>, vector<1x64xf32>
      %13 = vector.broadcast %12 : vector<1x64xf32> to vector<32x64xf32>
      %14 = arith.addf %11, %13 : vector<32x64xf32>
      %cst = arith.constant 0.000000e+00 : f32
      %15 = vector.broadcast %cst : f32 to vector<32x64xf32>
      %16 = arith.maximumf %14, %15 : vector<32x64xf32>
      %17 = arith.truncf %16 : vector<32x64xf32> to vector<32x64xbf16>
      %c0_7 = arith.constant 0 : index
      %c0_8 = arith.constant 0 : index
      %18 = vector.load %arg8[%c0_7, %c0_8] : memref<64x32xbf16, #tpu.memory_space<vmem>>, vector<64x32xbf16>
      %cst_9 = arith.constant dense<0.000000e+00> : vector<32x32xf32>
      %19 = tpu.matmul %17, %18, %cst_9 {dimension_numbers = #tpu.dot_dimension_numbers<[1], [0], [0], [1], [0, 0, 1, 1], [], []>} : vector<32x64xbf16>, vector<64x32xbf16>, vector<32x32xf32> -> vector<32x32xf32>
      %c0_10 = arith.constant 0 : index
      %c0_11 = arith.constant 0 : index
      %20 = vector.load %arg9[%c0_10, %c0_11] : memref<1x32xf32, #tpu.memory_space<vmem>>, vector<1x32xf32>
      %21 = vector.broadcast %20 : vector<1x32xf32> to vector<32x32xf32>
      %22 = arith.addf %19, %21 : vector<32x32xf32>
      %cst_12 = arith.constant 0.000000e+00 : f32
      %23 = vector.broadcast %cst_12 : f32 to vector<32x32xf32>
      %24 = arith.maximumf %22, %23 : vector<32x32xf32>
      %c0_13 = arith.constant 0 : index
      %c0_14 = arith.constant 0 : index
      %25 = vector.load %arg10[%c0_13, %c0_14] : memref<1x32xf32, #tpu.memory_space<vmem>>, vector<1x32xf32>
      %26 = vector.broadcast %25 : vector<1x32xf32> to vector<32x32xf32>
      %27 = arith.mulf %24, %26 : vector<32x32xf32>
      %cst_15 = arith.constant dense<0.000000e+00> : vector<32xf32>
      %28 = vector.multi_reduction <add>, %27, %cst_15 [1] : vector<32x32xf32> to vector<32xf32>
      %29 = vector.shape_cast %28 : vector<32xf32> to vector<32x1xf32>
      %c0_16 = arith.constant 0 : index
      %c0_17 = arith.constant 0 : index
      %30 = memref.load %arg11[%c0_16, %c0_17] : memref<1x1xf32, #tpu.memory_space<smem>>
      %31 = vector.broadcast %30 : f32 to vector<32x1xf32>
      %32 = arith.addf %29, %31 : vector<32x1xf32>
      %c0_18 = arith.constant 0 : index
      %c0_19 = arith.constant 0 : index
      %33 = vector.load %arg12[%c0_18, %c0_19] : memref<32x1xf32, #tpu.memory_space<vmem>>, vector<32x1xf32>
      tpu.vector_store %arg12[%c0_18, %c0_19], %32 {strides = array<i32>} : memref<32x1xf32, #tpu.memory_space<vmem>>, vector<32x1xf32>,
    } else {
    }
    return
  }
  func.func @transform_0(%arg0: i32, %arg1: i32) -> (i32, i32) {
    %c1_i32 = arith.constant 1 : i32
    %0 = arith.subi %c1_i32, %arg0 : i32
    %1 = arith.muli %arg1, %0 : i32
    %c0_i32 = arith.constant 0 : i32
    %c0_i32_0 = arith.constant 0 : i32
    return %1, %c0_i32 : i32, i32
  }
  func.func @transform_1(%arg0: i32, %arg1: i32) -> (i32, i32) {
    %c1_i32 = arith.constant 1 : i32
    %0 = arith.subi %c1_i32, %arg0 : i32
    %1 = arith.muli %arg1, %0 : i32
    %c0_i32 = arith.constant 0 : i32
    %c0_i32_0 = arith.constant 0 : i32
    return %1, %c0_i32 : i32, i32
  }
  func.func @transform_2(%arg0: i32, %arg1: i32) -> (i32, i32) {
    %c0_i32 = arith.constant 0 : i32
    %c0_i32_0 = arith.constant 0 : i32
    %c0_i32_1 = arith.constant 0 : i32
    return %c0_i32, %c0_i32_0 : i32, i32
  }
  func.func @transform_3(%arg0: i32, %arg1: i32) -> (i32, i32) {
    %c0_i32 = arith.constant 0 : i32
    %c0_i32_0 = arith.constant 0 : i32
    %c0_i32_1 = arith.constant 0 : i32
    return %c0_i32, %c0_i32_0 : i32, i32
  }
  func.func @transform_4(%arg0: i32, %arg1: i32) -> (i32, i32) {
    %c0_i32 = arith.constant 0 : i32
    %c0_i32_0 = arith.constant 0 : i32
    %c0_i32_1 = arith.constant 0 : i32
    return %c0_i32, %c0_i32_0 : i32, i32
  }
  func.func @transform_5(%arg0: i32, %arg1: i32) -> (i32, i32) {
    %c0_i32 = arith.constant 0 : i32
    %c0_i32_0 = arith.constant 0 : i32
    %c0_i32_1 = arith.constant 0 : i32
    return %c0_i32, %c0_i32_0 : i32, i32
  }
  func.func @transform_6(%arg0: i32, %arg1: i32) -> (i32, i32) {
    %c0_i32 = arith.constant 0 : i32
    %c0_i32_0 = arith.constant 0 : i32
    %c0_i32_1 = arith.constant 0 : i32
    return %c0_i32, %c0_i32_0 : i32, i32
  }
  func.func @transform_7(%arg0: i32, %arg1: i32) -> (i32, i32) {
    %c0_i32 = arith.constant 0 : i32
    %c0_i32_0 = arith.constant 0 : i32
    %c0_i32_1 = arith.constant 0 : i32
    return %c0_i32, %c0_i32_0 : i32, i32
  }
  func.func @transform_8(%arg0: i32, %arg1: i32) -> (i32, i32) {
    %c0_i32 = arith.constant 0 : i32
    %c0_i32_0 = arith.constant 0 : i32
    %c0_i32_1 = arith.constant 0 : i32
    return %c0_i32, %c0_i32_0 : i32, i32
  }
  func.func @transform_9(%arg0: i32, %arg1: i32) -> (i32, i32) {
    %c0_i32 = arith.constant 0 : i32
    %c0_i32_0 = arith.constant 0 : i32
    %c0_i32_1 = arith.constant 0 : i32
    return %c0_i32, %c0_i32_0 : i32, i32
  }
  func.func @transform_10(%arg0: i32, %arg1: i32) -> (i32, i32) {
    %0 = arith.muli %arg1, %arg0 : i32
    %c0_i32 = arith.constant 0 : i32
    %c0_i32_0 = arith.constant 0 : i32
    return %0, %c0_i32 : i32, i32
  }
}

</mosaic_0001>

<bundles_post_ra>
// kernel: tpu_custom_call.1
= control target key start
LH: loop header
LB: loop body
LE: loop exit
PB: predicated region body
PF: predicated region fallthrough
CT: control target
= control target key end

     0   :  { %s1096_s15 = smov 0   ;;  %s1098_s16 = smov 0   ;;  %s1220_s0 = inlined_call_operand.vmem [shape: f32[32,24], index: 0, kind: input, shape index: {}]   ;;  %s1221_s1 = inlined_call_operand.vmem [shape: f32[32,8], index: 1, kind: input, shape index: {}]   ;;  %s1222_s2 = inlined_call_operand.vmem [shape: bf16[24,64], index: 2, kind: input, shape index: {}]   ;;  %s1223_s3 = inlined_call_operand.vmem [shape: bf16[8,64], index: 3, kind: input, shape index: {}]   ;;  %s1224_s4 = inlined_call_operand.vmem [shape: f32[1,64], index: 4, kind: input, shape index: {}]   ;;  %s1225_s5 = inlined_call_operand.vmem [shape: f32[1,64], index: 5, kind: input, shape index: {}]   ;;  %s1226_s6 = inlined_call_operand.vmem [shape: bf16[64,32], index: 6, kind: input, shape index: {}]   ;;  %s1227_s7 = inlined_call_operand.vmem [shape: f32[1,32], index: 7, kind: input, shape index: {}]   ;;  %s1228_s8 = inlined_call_operand.vmem [shape: f32[1,32], index: 8, kind: input, shape index: {}]   ;;  %s1229_s9 = inlined_call_operand.<no memory space> [shape: f32[1,1], index: 9, kind: input, shape index: {}]   ;;  %s1230_s10 = inlined_call_operand.vmem [shape: f32[32,1], index: 10, kind: output, shape index: {}]  }
   0x1   :  { %15 = sst [smem:[#allocation5]] %s1229_s9  ;;  %s1100_s17 = smov 0  }
   0x2 LB: > { %s33_s9 = sadd.s32 1, %s1031_s16  ;;  %p912_p0 = scmp.ge.s32.totalorder %s1035_s17, 1  ;;  %s1035_s17 = sphi %s1100_s17, %s21_s17   ;;  %s1031_s16 = sphi %s1098_s16, %s1232_s16   ;;  %s1027_s15 = sphi %s1096_s15, %s1231_s15  }
   0x3   : > { %p35_p1 = scmp.ge.s32.totalorder %s33_s9, 2  ;;  %p355_p2 = scmp.lt.s32.totalorder %s1035_s17, 3 }
   0x5   : > { %s1234_s9 = smov (%p35_p1, %s33_s9), 0  ;;  %p356_p3 = pnand %p912_p0, %p355_p2 }
   0x6   : > { %p913_p4 = scmp.ne.s32.totalorder (!%p356_p3), %s1027_s15, 0 }
   0x7   : > { %359 = sbr.rel (%p356_p3) target bundleno = 685 (0x2ad), region = 60 }
   0xe   : > { %435 = sbr.rel (%p913_p4) target bundleno = 298 (0x12a), region = 64  ;;  %v1005_v0 = vld [vmem:[%s1222_s2] sm:$0xff] (!%p913_p4)   ;;  %vm466_vm0 = vcmask (!%p913_p4), 1043456   ;;  %v453_v3 = vld [vmem:[%s1221_s1 + $0x8] sm:$0xff] (!%p913_p4)  ;;  %vm459_vm1 = vcmask (!%p913_p4), 64512   ;;  %v454_v7 = vld [vmem:[%s1221_s1 + $0x10] sm:$0xff] (!%p913_p4) }
   0xf   : > { %v458_v1 = vld [vmem:[%s1223_s3] sm:$0xf] (!%p913_p4)  ;;  %954 = vmatprep.subr.bf16.mxu0 (!%p913_p4), %v1005_v0  ;;  %v1006_v6 = vld [vmem:[%s1222_s2 + $0x8] ss:$0 sps:$4 sm:$0xff] (!%p913_p4)   ;;  %v455_v8 = vld [vmem:[%s1221_s1 + $0x18] sm:$0xff] (!%p913_p4)  ;;  %vm528_vm2 = vcmask (!%p913_p4), 195584  }
  0x10   : > { %v452_v2 = vld [vmem:[%s1221_s1] sm:$0xff] (!%p913_p4)  ;;  %978 = vmatprep.subr.msk.bf16.mxu1 (!%p913_p4), %vm466_vm0, %v458_v1  ;;  %v468_v4 = vsel (!%p913_p4), %vm466_vm0, %v458_v1, 0  ;;  %955 = vmatpush3.bf16.msra.mxu0 (!%p913_p4), %v1005_v0  ;;  %v444_v10 = vld [vmem:[%s1220_s0 + $0x8] sm:$0xff] (!%p913_p4)  ;;  %v457_v11 = vpack.c.bf16 (!%p913_p4), %v455_v8, %v454_v7  ;;  %v536_v12 = vsel (!%p913_p4), %vm466_vm0, %v1006_v6, 0  ;;  %v445_v14 = vld [vmem:[%s1220_s0 + $0x10] sm:$0xff] (!%p913_p4)  ;;  %vm440_vm3 = vcmask (!%p913_p4), 516096  }
  0x11   : > { %v456_v5 = vpack.c.bf16 (!%p913_p4), %v453_v3, %v452_v2  ;;  %949 = vmatpush3.bf16.msra.mxu1 (!%p913_p4), %v468_v4  ;;  %v443_v9 = vld [vmem:[%s1220_s0] sm:$0xff] (!%p913_p4)  ;;  %979 = vmatprep.subr.msk.bf16.mxu0 (!%p913_p4), %vm466_vm0, %v1006_v6  ;;  %v446_v15 = vld [vmem:[%s1220_s0 + $0x18] sm:$0xff] (!%p913_p4)  ;;  %v1037_v17 = vmov (!%p913_p4), 0.0   ;;  %vm589_vm4 = vcmask (!%p913_p4), 523264  }
  0x12   : > { %v447_v13 = vpack.c.bf16 (!%p913_p4), %v444_v10, %v443_v9  ;;  %v448_v16 = vpack.c.bf16 (!%p913_p4), %v446_v15, %v445_v14  ;;  %441 = vst.msk [vmem:[#allocation3] sm:$0x1] (!%p913_p4), %vm440_vm3, %v1037_v17  ;;  %442 = vst.msk [vmem:[#allocation4] sm:$0x1] (!%p913_p4), %vm440_vm3, %v1037_v17  ;;  %v641_v8 = vld [vmem:[%s1224_s4] sm:$0x1] (!%p913_p4) }
  0x13   : > { %950 = vmatprep.mubr.msk.bf16.mxu1 (!%p913_p4), %vm459_vm1, %v456_v5 }
  0x14   : > { %951 = vmatmul.mubr.msk.bf16.vlgmr.msra.gmra.mrb[0].mxu1 (!%p913_p4), %vm459_vm1, %v457_v11  ;;  %958 = vmatprep.mubr.msk.bf16.mxu0 (!%p913_p4), %vm528_vm2, %v447_v13  ;;  %v646_v11 = vld [vmem:[%s1225_s5] sm:$0x1] (!%p913_p4) }
  0x15   : > { %957 = vmatpush3.bf16.msra.mxu0 %v536_v12 }
  0x18   : > { %959 = vmatmul.mubr.msk.bf16.vlgmr.msra.gmra.mrb[0].mxu0 %vm528_vm2, %v448_v16 }
  0x19   : > { %v594_v57 = vld [vmem:[#allocation3] sm:$0x1]  ;;  %v611_v60 = vld [vmem:[#allocation4] sm:$0x1] }
  0xe7   : > { %v952_v18 = vpop.f32.mrb[0].mxu1 }
  0xe8   : > { %v504_v19 = vpop.f32.mrb[1].mxu1 }
  0xe9   : > { %v953_v20 = vpop.f32.mrb[2].mxu1 }
  0xea   : > { %v507_v21 = vpop.f32.mrb[3].mxu1 }
  0xeb   : > { %v960_v22 = vpop.f32.mrb[0].mxu0 }
  0xec   : > { %v581_v23 = vadd.f32 %v960_v22, %v952_v18  ;;  %v572_v24 = vpop.f32.mrb[1].mxu0 }
  0xed   : > { %v573_v25 = vadd.f32 %v572_v24, %v504_v19  ;;  %v961_v26 = vpop.f32.mrb[2].mxu0 }
  0xee   : > { %592 = vst.msk [vmem:[#allocation2 + $0x10] sm:$0xff] %vm589_vm4, %v581_v23  ;;  %v584_v27 = vadd.f32 %v961_v26, %v953_v20  ;;  %v575_v28 = vpop.f32.mrb[3].mxu0  ;;  %v614_v31 = vmul.f32 %v581_v23, %v581_v23  ;;  %v598_v36 = vsel %vm589_vm4, %v581_v23, 0.0 }
  0xef   : > { %590 = vst.msk [vmem:[#allocation2] sm:$0xff] %vm589_vm4, %v573_v25  ;;  %v612_v29 = vmul.f32 %v573_v25, %v573_v25  ;;  %v576_v30 = vadd.f32 %v575_v28, %v507_v21  ;;  %v595_v32 = vsel %vm589_vm4, %v573_v25, 0.0 }
  0xf0   : > { %593 = vst.msk [vmem:[#allocation2 + $0x18] sm:$0xff] %vm589_vm4, %v584_v27  ;;  %v615_v38 = vmul.f32 %v584_v27, %v584_v27  ;;  %v619_v42 = vsel %vm589_vm4, %v614_v31, 0.0  ;;  %v600_v43 = vsel %vm589_vm4, %v584_v27, 0.0 }
  0xf1   : > { %591 = vst.msk [vmem:[#allocation2 + $0x8] sm:$0xff] %vm589_vm4, %v576_v30  ;;  %v596_v33 = vsel %vm589_vm4, %v576_v30, 0.0  ;;  %v613_v34 = vmul.f32 %v576_v30, %v576_v30  ;;  %v616_v37 = vsel %vm589_vm4, %v612_v29, 0.0 }
  0xf2   : > { %v597_v35 = vadd.f32 %v596_v33, %v595_v32  ;;  %v621_v46 = vsel %vm589_vm4, %v615_v38, 0.0 }
  0xf3   : > { %v617_v39 = vsel %vm589_vm4, %v613_v34, 0.0 }
  0xf4   : > { %v599_v40 = vadd.f32 %v598_v36, %v597_v35  ;;  %v618_v41 = vadd.f32 %v617_v39, %v616_v37 }
  0xf6   : > { %v601_v44 = vadd.f32 %v600_v43, %v599_v40  ;;  %v620_v45 = vadd.f32 %v619_v42, %v618_v41 }
  0xf8   : > { %v602_v47 = vrot.slane %v601_v44, 4  ;;  %v622_v48 = vadd.f32 %v621_v46, %v620_v45 }
  0xfa   : > { %v603_v49 = vadd.f32 %v602_v47, %v601_v44  ;;  %v623_v50 = vrot.slane %v622_v48, 4 }
  0xfc   : > { %v604_v51 = vrot.slane %v603_v49, 2  ;;  %v624_v52 = vadd.f32 %v623_v50, %v622_v48 }
  0xfe   : > { %v605_v53 = vadd.f32 %v604_v51, %v603_v49  ;;  %v625_v54 = vrot.slane %v624_v52, 2 }
 0x100   : > { %v606_v55 = vrot.slane %v605_v53, 1  ;;  %v626_v56 = vadd.f32 %v625_v54, %v624_v52 }
 0x102   : > { %v607_v58 = vadd.f32 %v606_v55, %v605_v53  ;;  %v627_v59 = vrot.slane %v626_v56, 1 }
 0x104   : > { %v608_v61 = vadd.f32 %v607_v58, %v594_v57  ;;  %v628_v62 = vadd.f32 %v627_v59, %v626_v56 }
 0x106   : > { %610 = vst.msk [vmem:[#allocation3] sm:$0x1] %vm440_vm3, %v608_v61  ;;  %v629_v63 = vadd.f32 %v628_v62, %v611_v60 }
 0x108   : > { %630 = vst.msk [vmem:[#allocation4] sm:$0x1] %vm440_vm3, %v629_v63 }
 0x10d   : > { %v634_v0 = vld [vmem:[#allocation3] sm:$0x1] }
 0x10e   : > { %v635_v1 = vmul.f32 0.033333335, %v634_v0 }
 0x10f   : > { %v636_v2 = vld [vmem:[#allocation4] sm:$0x1] }
 0x110   : > { %v637_v3 = vmul.f32 0.033333335, %v636_v2  ;;  %v638_v4 = vmul.f32 %v635_v1, %v635_v1 }
 0x112   : > { %v639_v5 = vsub.f32 %v637_v3, %v638_v4 }
 0x114   : > { %v640_v6 = vmax.f32 %v639_v5, 0.0 }
 0x116   : > { %v642_v7 = vadd.f32 1e-05, %v640_v6 }
 0x118   : > { %1007 = vrsqrt.f32 %v642_v7 }
 0x122   : > { %v1008_v9 = vpop.eup %1007 }
 0x123   : > { %v644_v10 = vmul.f32 %v1008_v9, %v641_v8 }
 0x125   : > { %645 = vst.msk [vmem:[#allocation3] sm:$0x1] %vm440_vm3, %v644_v10  ;;  %v647_v12 = vmul.f32 %v644_v10, %v635_v1 }
 0x127   : > { %v648_v13 = vsub.f32 %v646_v11, %v647_v12 }
 0x129   : > { %649 = vst.msk [vmem:[#allocation4] sm:$0x1] %vm440_vm3, %v648_v13 }
 0x12a PF: > { %p920_p5 = scmp.ne.s32.totalorder %s1027_s15, 1 }
 0x12b   : > { %v1009_v14 = vld [vmem:[%s1226_s6] sm:$0xff] (!%p920_p5)   ;;  %v1010_v15 = vld [vmem:[%s1226_s6 + $0x8] sm:$0xff] (!%p920_p5)   ;;  %v1011_v16 = vld [vmem:[%s1226_s6 + $0x10] sm:$0xff] (!%p920_p5)   ;;  %vm727_vm5 = vcmask (!%p920_p5), 523264   ;;  %vm798_vm6 = vcmask (!%p920_p5), 261120   ;;  %s811_s21 = sld [smem:[#allocation5]] (!%p920_p5) }
 0x12c   : > { %653 = sbr.rel (%p920_p5) target bundleno = 685 (0x2ad), region = 76  ;;  %962 = vmatprep.subr.bf16.mxu0 (!%p920_p5), %v1009_v14  ;;  %v656_v17 = vld [vmem:[#allocation2] sm:$0xff] (!%p920_p5)  ;;  %v657_v18 = vld [vmem:[#allocation2 + $0x8] sm:$0xff] (!%p920_p5)  ;;  %v658_v23 = vld [vmem:[#allocation2 + $0x10] sm:$0xff] (!%p920_p5)  ;;  %vm817_vm7 = vcmask (!%p920_p5), 7168  }
 0x12d   : > { %963 = vmatpush3.bf16.msra.mxu0 (!%p920_p5), %v1009_v14  ;;  %v659_v24 = vld [vmem:[#allocation2 + $0x18] sm:$0xff] (!%p920_p5)  ;;  %v923_v38 = vld [vmem:[%s1227_s7] ss:$0 sm:$0xff] (!%p920_p5) }
 0x12e   : > { %964 = vmatprep.subr.bf16.mxu0 (!%p920_p5), %v1010_v15  ;;  %v921_v19 = vld [vmem:[#allocation3] ss:$0 sm:$0xff] (!%p920_p5)  ;;  %v1012_v29 = vld [vmem:[%s1226_s6 + $0x18] sm:$0xff] (!%p920_p5)  }
 0x12f   : > { %v667_v20 = vmul.f32 (!%p920_p5), %v921_v19, %v656_v17  ;;  %v668_v21 = vmul.f32 (!%p920_p5), %v921_v19, %v657_v18  ;;  %v669_v25 = vmul.f32 (!%p920_p5), %v921_v19, %v658_v23  ;;  %v670_v26 = vmul.f32 (!%p920_p5), %v921_v19, %v659_v24  ;;  %v930_v44 = vld [vmem:[%s1228_s8] ss:$0 sm:$0xff] (!%p920_p5) }
 0x130   : > { %v922_v22 = vld [vmem:[#allocation4] ss:$0 sm:$0xff] (!%p920_p5) }
 0x131   : > { %965 = vmatpush3.bf16.msra.mxu0 (!%p920_p5), %v1010_v15  ;;  %v678_v27 = vadd.f32 (!%p920_p5), %v922_v22, %v667_v20  ;;  %v679_v28 = vadd.f32 (!%p920_p5), %v922_v22, %v668_v21  ;;  %v680_v30 = vadd.f32 (!%p920_p5), %v922_v22, %v669_v25  ;;  %v681_v31 = vadd.f32 (!%p920_p5), %v922_v22, %v670_v26 }
 0x132   : > { %966 = vmatprep.subr.bf16.mxu0 (!%p920_p5), %v1011_v16  ;;  %v812_v60 = vstv (!%p920_p5), %s811_s21 }
 0x133   : > { %v682_v32 = vmax.f32 %v678_v27, 0.0  ;;  %v683_v33 = vmax.f32 %v679_v28, 0.0  ;;  %v684_v34 = vmax.f32 %v680_v30, 0.0  ;;  %v685_v35 = vmax.f32 %v681_v31, 0.0 }
 0x135   : > { %967 = vmatpush3.bf16.msra.mxu0 %v1011_v16  ;;  %v686_v36 = vpack.c.bf16 %v683_v33, %v682_v32  ;;  %v687_v37 = vpack.c.bf16 %v685_v35, %v684_v34 }
 0x136   : > { %968 = vmatprep.subr.bf16.mxu0 %v1012_v29 }
 0x137   : > { %970 = vmatprep.mubr.msk.bf16.mxu0 %vm727_vm5, %v686_v36 }
 0x139   : > { %969 = vmatpush3.bf16.msra.mxu0 %v1012_v29 }
 0x13c   : > { %971 = vmatmul.mubr.msk.bf16.vlgmr.msra.gmra.mrb[0].mxu0 %vm727_vm5, %v687_v37 }
 0x20f   : > { %v972_v39 = vpop.f32.mrb[0].mxu0 }
 0x210   : > { %v777_v40 = vadd.f32 %v972_v39, %v923_v38  ;;  %v768_v41 = vpop.f32.mrb[1].mxu0 }
 0x211   : > { %v769_v42 = vadd.f32 %v923_v38, %v768_v41  ;;  %v973_v43 = vpop.f32.mrb[2].mxu0 }
 0x212   : > { %v785_v45 = vmax.f32 %v777_v40, 0.0  ;;  %v780_v46 = vadd.f32 %v973_v43, %v923_v38  ;;  %v771_v47 = vpop.f32.mrb[3].mxu0 }
 0x213   : > { %v783_v48 = vmax.f32 %v769_v42, 0.0  ;;  %v772_v49 = vadd.f32 %v923_v38, %v771_v47 }
 0x214   : > { %v786_v50 = vmax.f32 %v780_v46, 0.0  ;;  %v796_v51 = vmul.f32 %v930_v44, %v785_v45 }
 0x215   : > { %v784_v52 = vmax.f32 %v772_v49, 0.0  ;;  %v794_v53 = vmul.f32 %v930_v44, %v783_v48 }
 0x216   : > { %v805_v54 = vsel %vm798_vm6, %v796_v51, 0.0  ;;  %v797_v55 = vmul.f32 %v930_v44, %v786_v50 }
 0x217   : > { %806 = vadd.xlane.f32.xlu1 %v805_v54  ;;  %v799_v56 = vsel %vm798_vm6, %v794_v53, 0.0  ;;  %v795_v57 = vmul.f32 %v930_v44, %v784_v52 }
 0x218   : > { %800 = vadd.xlane.f32.xlu0 %v799_v56  ;;  %v808_v58 = vsel %vm798_vm6, %v797_v55, 0.0 }
 0x219   : > { %v802_v59 = vsel %vm798_vm6, %v795_v57, 0.0 }
 0x21b   : > { %809 = vadd.xlane.f32.xlu1 %v808_v58 }
 0x21c   : > { %803 = vadd.xlane.f32.xlu0 %v802_v59 }
 0x2a4   : > { %v807_v61 = vpop.xlane.xlu1 %806 }
 0x2a5   : > { %v815_v62 = vadd.f32 %v812_v60, %v807_v61  ;;  %v801_v63 = vpop.xlane.xlu0 %800 }
 0x2a6   : > { %v813_v0 = vadd.f32 %v812_v60, %v801_v63 }
 0x2a7   : > { %820 = vst.msk [vmem:[%s1230_s10 + $0x10] sm:$0xff] %vm817_vm7, %v815_v62 }
 0x2a8   : > { %818 = vst.msk [vmem:[%s1230_s10] sm:$0xff] %vm817_vm7, %v813_v0  ;;  %v810_v1 = vpop.xlane.xlu1 %809 }
 0x2a9   : > { %v816_v2 = vadd.f32 %v812_v60, %v810_v1  ;;  %v804_v3 = vpop.xlane.xlu0 %803 }
 0x2aa   : > { %v814_v4 = vadd.f32 %v812_v60, %v804_v3 }
 0x2ab   : > { %821 = vst.msk [vmem:[%s1230_s10 + $0x18] sm:$0xff] %vm817_vm7, %v816_v2 }
 0x2ac   : > { %819 = vst.msk [vmem:[%s1230_s10 + $0x8] sm:$0xff] %vm817_vm7, %v814_v4 }
 0x2ad PF: > { %s21_s17 = sadd.s32 1, %s1035_s17   ;;  %s1231_s15 = smov %s1031_s16 }
 0x2ae   : > { %p18_p6 = scmp.ge.s32.totalorder %s21_s17, 4   ;;  %s1232_s16 = smov %s1234_s9 }
 0x2b0   :  { %20 = sbr.rel (!%p18_p6) target bundleno = 2 (0x2), region = 111 }

</bundles_post_ra>
